<compile_context>
chip_gen: v5e
topology: v5e:2x2
jax: 0.10.0
libtpu: 0.0.40
codegen_flags: <defaults>
</compile_context>

<pallas_src>
import functools

import jax
import jax.numpy as jnp
import numpy as np
from jax.experimental import pallas as pl
from jax.experimental.pallas import tpu as pltpu


def _dice_loss_kernel(x_ref, t_ref, out_ref, inter_acc, z_acc, y_acc, *, n_classes):
    """Grid = (sample n, spatial tile hw).

    x_ref:   (1, C, T)   logits tile (any float dtype; upcast to f32)
    t_ref:   (1, 1, T)   int32 labels tile
    out_ref: (1, 1, 128) f32 per-sample loss (broadcast along lanes)
    *_acc:   (C, 1)      f32 per-class accumulators, resident across the hw axis
    """
    hw = pl.program_id(1)

    @pl.when(hw == 0)
    def _init():
        inter_acc[...] = jnp.zeros_like(inter_acc)
        z_acc[...] = jnp.zeros_like(z_acc)
        y_acc[...] = jnp.zeros_like(y_acc)

    x = x_ref[0].astype(jnp.float32)           # (C, T)
    t = t_ref[0]                               # (1, T) int32
    C, T = x.shape

    # per-pixel softmax over the class (sublane) axis
    m = jnp.max(x, axis=0, keepdims=True)      # (1, T)
    e = jnp.exp(x - m)                         # (C, T)
    s = jnp.sum(e, axis=0, keepdims=True)      # (1, T)
    p = e * pl.reciprocal(s, approx=False)     # (C, T)

    # one-hot for all classes at once (onehot^2 == onehot)
    cls = jax.lax.broadcasted_iota(jnp.int32, (C, T), 0)
    onehot = (t == cls).astype(jnp.float32)    # (C, T)

    # three vectorized per-class cross-lane reductions (instead of 3*C scalar ones)
    inter_acc[...] += jnp.sum(p * onehot, axis=1, keepdims=True)
    z_acc[...] += jnp.sum(p * p, axis=1, keepdims=True)
    y_acc[...] += jnp.sum(onehot, axis=1, keepdims=True)

    @pl.when(hw == pl.num_programs(1) - 1)
    def _finalize():
        smooth = jnp.float32(1e-5)
        num = 2.0 * inter_acc[...] + smooth
        den = z_acc[...] + y_acc[...] + smooth
        dice = 1.0 - num * pl.reciprocal(den, approx=False)      # (C, 1)
        loss = jnp.sum(dice) * jnp.float32(1.0 / n_classes)
        out_ref[...] = jnp.full(out_ref.shape, loss, dtype=out_ref.dtype)


def _pick_tile_hw(hw: int, cap: int = 8192) -> int:
    """Largest multiple-of-128 tile dividing hw, capped at `cap`; else the full hw."""
    if hw <= cap or hw % 128 != 0:
        return hw
    best = 128
    for t in range(128, cap + 1, 128):
        if hw % t == 0:
            best = t
    return best


def dice_loss_tunet(inputs, target, n_classes, tile_hw=None):
    """Pallas implementation of DiceLoss_TUnet.forward(inputs, target).

    inputs: (N, C, H, W) float logits;  target: (N, H, W) integer labels.
    Returns (N,) float32 per-sample loss (dice averaged over classes).
    """
    N, C, H, W = inputs.shape
    assert C == n_classes, (inputs.shape, n_classes)
    assert target.shape == (N, H, W)
    HW = H * W

    if tile_hw is None:
        tile_hw = _pick_tile_hw(HW)
    assert HW % tile_hw == 0, (HW, tile_hw)
    num_hw = HW // tile_hw

    # Lane-dense flattened layout: logits (N, C, HW), labels (N, 1, HW).
    x = inputs.reshape(N, C, HW)
    t = target.reshape(N, 1, HW).astype(jnp.int32)

    kernel = functools.partial(_dice_loss_kernel, n_classes=n_classes)
    out = pl.pallas_call(
        kernel,
        out_shape=jax.ShapeDtypeStruct((N, 1, 128), jnp.float32),
        grid_spec=pltpu.PrefetchScalarGridSpec(
            num_scalar_prefetch=0,
            grid=(N, num_hw),
            in_specs=[
                pl.BlockSpec((1, C, tile_hw), lambda n, h: (n, 0, h)),
                pl.BlockSpec((1, 1, tile_hw), lambda n, h: (n, 0, h)),
            ],
            out_specs=pl.BlockSpec((1, 1, 128), lambda n, h: (n, 0, 0)),
            scratch_shapes=[
                pltpu.VMEM((C, 1), jnp.float32),   # intersection per class
                pltpu.VMEM((C, 1), jnp.float32),   # sum(p^2)      per class
                pltpu.VMEM((C, 1), jnp.float32),   # sum(onehot)   per class
            ],
        ),
        compiler_params=pltpu.CompilerParams(
            dimension_semantics=("parallel", "arbitrary"),
            vmem_limit_bytes=32 * 1024 * 1024,
        ),
    )(x, t)
    return out[:, 0, 0]


def dice_loss_ref(inputs, target, n_classes):
    """Plain-JAX reference mirroring the PyTorch forward exactly."""
    p = jax.nn.softmax(inputs.astype(jnp.float32), axis=1)
    onehot = jax.nn.one_hot(target, n_classes, axis=1, dtype=jnp.float32)
    smooth = 1e-5
    N = inputs.shape[0]
    loss = jnp.zeros((N,), jnp.float32)
    for i in range(n_classes):
        pred = p[:, i].reshape(N, -1)
        tgt = onehot[:, i].reshape(N, -1)
        inter = jnp.sum(pred * tgt, axis=1)
        y_sum = jnp.sum(tgt * tgt, axis=1)
        z_sum = jnp.sum(pred * pred, axis=1)
        loss = loss + (1.0 - (2.0 * inter + smooth) / (z_sum + y_sum + smooth))
    return loss / n_classes


if __name__ == "__main__":
    # small shapes consistent with the module: N=2 samples, C=4 classes, 16x16
    N, C, H, W = 2, 4, 16, 16
    key = jax.random.PRNGKey(0)
    k_logits, k_labels = jax.random.split(key)
    logits = jax.random.normal(k_logits, (N, C, H, W), dtype=jnp.float32)
    labels = jax.random.randint(k_labels, (N, H, W), 0, C, dtype=jnp.int32)

    ref = jax.block_until_ready(dice_loss_ref(logits, labels, n_classes=C))

    out = jax.block_until_ready(dice_loss_tunet(logits, labels, n_classes=C))
    assert out.shape == (N,)
    assert np.allclose(np.asarray(out), np.asarray(ref), rtol=1e-5, atol=1e-5), (out, ref)

    # also exercise the multi-tile spatial-accumulator path (grid = (N, 2))
    out_tiled = jax.block_until_ready(
        dice_loss_tunet(logits, labels, n_classes=C, tile_hw=128))
    assert np.allclose(np.asarray(out_tiled), np.asarray(ref), rtol=1e-5, atol=1e-5), (
        out_tiled, ref)

    print("KERNEL_OK")
</pallas_src>

<mosaic_0001>
module attributes {stable_mosaic.version = 11 : i64} {
  func.func @_dice_loss_kernel(%arg0: i32, %arg1: i32, %arg2: memref<1x4x256xf32, #tpu.memory_space<vmem>>, %arg3: memref<1x1x256xi32, #tpu.memory_space<vmem>>, %arg4: memref<1x1x128xf32, #tpu.memory_space<vmem>>, %arg5: memref<4x1xf32, #tpu.memory_space<vmem>>, %arg6: memref<4x1xf32, #tpu.memory_space<vmem>>, %arg7: memref<4x1xf32, #tpu.memory_space<vmem>>) attributes {dimension_semantics = [#tpu.dimension_semantics<parallel>, #tpu.dimension_semantics<arbitrary>], iteration_bounds = array<i64: 2, 1>, scalar_prefetch = 0 : i64, scratch_operands = 3 : i64, tpu.core_type = #tpu.core_type<tc>, window_params = [{transform_indices = @transform_0, window_bounds = array<i64: 1, 4, 256>}, {transform_indices = @transform_1, window_bounds = array<i64: 1, 1, 256>}, {transform_indices = @transform_2, window_bounds = array<i64: 1, 1, 128>}]} {
    %c0_i32 = arith.constant 0 : i32
    %0 = arith.cmpi eq, %arg1, %c0_i32 : i32
    %1 = arith.extui %0 : i1 to i32
    %c0_i32_0 = arith.constant 0 : i32
    %2 = arith.cmpi ne, %1, %c0_i32_0 : i32
    scf.if %2 {
      %cst_24 = arith.constant 0.000000e+00 : f32
      %42 = vector.broadcast %cst_24 : f32 to vector<4x1xf32>
      %c0_25 = arith.constant 0 : index
      %c0_26 = arith.constant 0 : index
      %43 = vector.load %arg5[%c0_25, %c0_26] : memref<4x1xf32, #tpu.memory_space<vmem>>, vector<4x1xf32>
      tpu.vector_store %arg5[%c0_25, %c0_26], %42 {strides = array<i32>} : memref<4x1xf32, #tpu.memory_space<vmem>>, vector<4x1xf32>,
      %cst_27 = arith.constant 0.000000e+00 : f32
      %44 = vector.broadcast %cst_27 : f32 to vector<4x1xf32>
      %c0_28 = arith.constant 0 : index
      %c0_29 = arith.constant 0 : index
      %45 = vector.load %arg6[%c0_28, %c0_29] : memref<4x1xf32, #tpu.memory_space<vmem>>, vector<4x1xf32>
      tpu.vector_store %arg6[%c0_28, %c0_29], %44 {strides = array<i32>} : memref<4x1xf32, #tpu.memory_space<vmem>>, vector<4x1xf32>,
      %cst_30 = arith.constant 0.000000e+00 : f32
      %46 = vector.broadcast %cst_30 : f32 to vector<4x1xf32>
      %c0_31 = arith.constant 0 : index
      %c0_32 = arith.constant 0 : index
      %47 = vector.load %arg7[%c0_31, %c0_32] : memref<4x1xf32, #tpu.memory_space<vmem>>, vector<4x1xf32>
      tpu.vector_store %arg7[%c0_31, %c0_32], %46 {strides = array<i32>} : memref<4x1xf32, #tpu.memory_space<vmem>>, vector<4x1xf32>,
    } else {
    }
    %c0 = arith.constant 0 : index
    %c0_1 = arith.constant 0 : index
    %c0_2 = arith.constant 0 : index
    %3 = vector.load %arg2[%c0, %c0_1, %c0_2] : memref<1x4x256xf32, #tpu.memory_space<vmem>>, vector<1x4x256xf32>
    %4 = vector.shape_cast %3 : vector<1x4x256xf32> to vector<4x256xf32>
    %c0_3 = arith.constant 0 : index
    %c0_4 = arith.constant 0 : index
    %c0_5 = arith.constant 0 : index
    %5 = vector.load %arg3[%c0_3, %c0_4, %c0_5] : memref<1x1x256xi32, #tpu.memory_space<vmem>>, vector<1x1x256xi32>
    %6 = vector.shape_cast %5 : vector<1x1x256xi32> to vector<1x256xi32>
    %cst = arith.constant dense<0xFF800000> : vector<256xf32>
    %7 = vector.multi_reduction <maximumf>, %4, %cst [0] : vector<4x256xf32> to vector<256xf32>
    %8 = vector.shape_cast %7 : vector<256xf32> to vector<1x256xf32>
    %9 = vector.broadcast %8 : vector<1x256xf32> to vector<4x256xf32>
    %10 = arith.subf %4, %9 : vector<4x256xf32>
    %11 = math.exp %10 : vector<4x256xf32>
    %cst_6 = arith.constant dense<0.000000e+00> : vector<256xf32>
    %12 = vector.multi_reduction <add>, %11, %cst_6 [0] : vector<4x256xf32> to vector<256xf32>
    %13 = vector.shape_cast %12 : vector<256xf32> to vector<1x256xf32>
    %14 = tpu.reciprocal %13 : vector<1x256xf32> -> vector<1x256xf32>
    %15 = vector.broadcast %14 : vector<1x256xf32> to vector<4x256xf32>
    %16 = arith.mulf %11, %15 : vector<4x256xf32>
    %17 = tpu.iota {dimensions = array<i32: 0>} : vector<4x256xi32>
    %18 = vector.broadcast %6 : vector<1x256xi32> to vector<4x256xi32>
    %19 = arith.cmpi eq, %18, %17 : vector<4x256xi32>
    %20 = arith.extui %19 : vector<4x256xi1> to vector<4x256xi32>
    %21 = arith.sitofp %20 : vector<4x256xi32> to vector<4x256xf32>
    %c0_7 = arith.constant 0 : index
    %c0_8 = arith.constant 0 : index
    %22 = vector.load %arg5[%c0_7, %c0_8] : memref<4x1xf32, #tpu.memory_space<vmem>>, vector<4x1xf32>
    %23 = arith.mulf %16, %21 : vector<4x256xf32>
    %cst_9 = arith.constant dense<0.000000e+00> : vector<4xf32>
    %24 = vector.multi_reduction <add>, %23, %cst_9 [1] : vector<4x256xf32> to vector<4xf32>
    %25 = vector.shape_cast %24 : vector<4xf32> to vector<4x1xf32>
    %26 = arith.addf %22, %25 : vector<4x1xf32>
    %c0_10 = arith.constant 0 : index
    %c0_11 = arith.constant 0 : index
    %27 = vector.load %arg5[%c0_10, %c0_11] : memref<4x1xf32, #tpu.memory_space<vmem>>, vector<4x1xf32>
    tpu.vector_store %arg5[%c0_10, %c0_11], %26 {strides = array<i32>} : memref<4x1xf32, #tpu.memory_space<vmem>>, vector<4x1xf32>,
    %c0_12 = arith.constant 0 : index
    %c0_13 = arith.constant 0 : index
    %28 = vector.load %arg6[%c0_12, %c0_13] : memref<4x1xf32, #tpu.memory_space<vmem>>, vector<4x1xf32>
    %29 = arith.mulf %16, %16 : vector<4x256xf32>
    %cst_14 = arith.constant dense<0.000000e+00> : vector<4xf32>
    %30 = vector.multi_reduction <add>, %29, %cst_14 [1] : vector<4x256xf32> to vector<4xf32>
    %31 = vector.shape_cast %30 : vector<4xf32> to vector<4x1xf32>
    %32 = arith.addf %28, %31 : vector<4x1xf32>
    %c0_15 = arith.constant 0 : index
    %c0_16 = arith.constant 0 : index
    %33 = vector.load %arg6[%c0_15, %c0_16] : memref<4x1xf32, #tpu.memory_space<vmem>>, vector<4x1xf32>
    tpu.vector_store %arg6[%c0_15, %c0_16], %32 {strides = array<i32>} : memref<4x1xf32, #tpu.memory_space<vmem>>, vector<4x1xf32>,
    %c0_17 = arith.constant 0 : index
    %c0_18 = arith.constant 0 : index
    %34 = vector.load %arg7[%c0_17, %c0_18] : memref<4x1xf32, #tpu.memory_space<vmem>>, vector<4x1xf32>
    %cst_19 = arith.constant dense<0.000000e+00> : vector<4xf32>
    %35 = vector.multi_reduction <add>, %21, %cst_19 [1] : vector<4x256xf32> to vector<4xf32>
    %36 = vector.shape_cast %35 : vector<4xf32> to vector<4x1xf32>
    %37 = arith.addf %34, %36 : vector<4x1xf32>
    %c0_20 = arith.constant 0 : index
    %c0_21 = arith.constant 0 : index
    %38 = vector.load %arg7[%c0_20, %c0_21] : memref<4x1xf32, #tpu.memory_space<vmem>>, vector<4x1xf32>
    tpu.vector_store %arg7[%c0_20, %c0_21], %37 {strides = array<i32>} : memref<4x1xf32, #tpu.memory_space<vmem>>, vector<4x1xf32>,
    %c0_i32_22 = arith.constant 0 : i32
    %39 = arith.cmpi eq, %arg1, %c0_i32_22 : i32
    %40 = arith.extui %39 : i1 to i32
    %c0_i32_23 = arith.constant 0 : i32
    %41 = arith.cmpi ne, %40, %c0_i32_23 : i32
    scf.if %41 {
      %c0_24 = arith.constant 0 : index
      %c0_25 = arith.constant 0 : index
      %42 = vector.load %arg5[%c0_24, %c0_25] : memref<4x1xf32, #tpu.memory_space<vmem>>, vector<4x1xf32>
      %cst_26 = arith.constant 2.000000e+00 : f32
      %43 = vector.broadcast %cst_26 : f32 to vector<4x1xf32>
      %44 = arith.mulf %43, %42 : vector<4x1xf32>
      %cst_27 = arith.constant 9.99999974E-6 : f32
      %45 = vector.broadcast %cst_27 : f32 to vector<4x1xf32>
      %46 = arith.addf %44, %45 : vector<4x1xf32>
      %c0_28 = arith.constant 0 : index
      %c0_29 = arith.constant 0 : index
      %47 = vector.load %arg6[%c0_28, %c0_29] : memref<4x1xf32, #tpu.memory_space<vmem>>, vector<4x1xf32>
      %c0_30 = arith.constant 0 : index
      %c0_31 = arith.constant 0 : index
      %48 = vector.load %arg7[%c0_30, %c0_31] : memref<4x1xf32, #tpu.memory_space<vmem>>, vector<4x1xf32>
      %49 = arith.addf %47, %48 : vector<4x1xf32>
      %cst_32 = arith.constant 9.99999974E-6 : f32
      %50 = vector.broadcast %cst_32 : f32 to vector<4x1xf32>
      %51 = arith.addf %49, %50 : vector<4x1xf32>
      %52 = tpu.reciprocal %51 : vector<4x1xf32> -> vector<4x1xf32>
      %53 = arith.mulf %46, %52 : vector<4x1xf32>
      %cst_33 = arith.constant 1.000000e+00 : f32
      %54 = vector.broadcast %cst_33 : f32 to vector<4x1xf32>
      %55 = arith.subf %54, %53 : vector<4x1xf32>
      %56 = vector.shape_cast %55 : vector<4x1xf32> to vector<1x4x1xf32>
      %cst_34 = arith.constant dense<0.000000e+00> : vector<1xf32>
      %57 = vector.multi_reduction <add>, %56, %cst_34 [1, 2] : vector<1x4x1xf32> to vector<1xf32>
      %58 = vector.shape_cast %57 : vector<1xf32> to vector<1x1x1xf32>
      %59 = vector.extract %58[0, 0, 0] : f32 from vector<1x1x1xf32>
      %cst_35 = arith.constant 2.500000e-01 : f32
      %60 = arith.mulf %59, %cst_35 : f32
      %61 = vector.broadcast %60 : f32 to vector<1x1x128xf32>
      %c0_36 = arith.constant 0 : index
      %c0_37 = arith.constant 0 : index
      %c0_38 = arith.constant 0 : index
      %62 = vector.load %arg4[%c0_36, %c0_37, %c0_38] : memref<1x1x128xf32, #tpu.memory_space<vmem>>, vector<1x1x128xf32>
      tpu.vector_store %arg4[%c0_36, %c0_37, %c0_38], %61 {strides = array<i32>} : memref<1x1x128xf32, #tpu.memory_space<vmem>>, vector<1x1x128xf32>,
    } else {
    }
    return
  }
  func.func @transform_0(%arg0: i32, %arg1: i32) -> (i32, i32, i32) {
    %c0_i32 = arith.constant 0 : i32
    %c0_i32_0 = arith.constant 0 : i32
    return %arg0, %c0_i32, %arg1 : i32, i32, i32
  }
  func.func @transform_1(%arg0: i32, %arg1: i32) -> (i32, i32, i32) {
    %c0_i32 = arith.constant 0 : i32
    %c0_i32_0 = arith.constant 0 : i32
    return %arg0, %c0_i32, %arg1 : i32, i32, i32
  }
  func.func @transform_2(%arg0: i32, %arg1: i32) -> (i32, i32, i32) {
    %c0_i32 = arith.constant 0 : i32
    %c0_i32_0 = arith.constant 0 : i32
    %c0_i32_1 = arith.constant 0 : i32
    return %arg0, %c0_i32, %c0_i32_0 : i32, i32, i32
  }
}

</mosaic_0001>

<bundles_post_ra>
// kernel: tpu_custom_call.1
= control target key start
LH: loop header
LB: loop body
LE: loop exit
PB: predicated region body
PF: predicated region fallthrough
CT: control target
= control target key end

     0   :  { %7 = vsyncpa [#allocation6], 0  ;;  %s960_s0 = inlined_call_operand.hbm [shape: f32[2,4,256], index: 0, kind: input, shape index: {}]   ;;  %s961_s1 = inlined_call_operand.hbm [shape: s32[2,1,256], index: 1, kind: input, shape index: {}]   ;;  %s962_s2 = inlined_call_operand.hbm [shape: f32[2,1,128], index: 2, kind: output, shape index: {}]  }
   0x1   :  { %9 = vsyncpa [#allocation6 + $0x1], 0 }
   0x2   :  { %10 = vsyncpa [#allocation9], 0 }
   0x3   :  { %12 = vsyncpa [#allocation9 + $0x1], 0 }
   0x4   :  { %13 = vsyncpa [#allocation7], 0 }
   0x5   :  { %15 = vsyncpa [#allocation7 + $0x1], 0  ;;  %s782_s9 = smov 0   ;;  %s784_s10 = smov 0  }
   0x6   :  { %s786_s11 = smov 0   ;;  %s788_s12 = smov 0  }
   0x7   :  { %s790_s13 = smov 0   ;;  %s792_s14 = smov 0  }
   0x8 LB: > { %s523_s15 = sadd.s32 4294967295, %s764_s14   ;;  %s524_s16 = sadd.s32 4294967294, %s764_s14   ;;  %s764_s14 = sphi %s792_s14, %s21_s14   ;;  %s760_s13 = sphi %s790_s13, %s976_s13   ;;  %s756_s12 = sphi %s788_s12, %s975_s12   ;;  %s752_s11 = sphi %s786_s11, %s974_s11   ;;  %s748_s10 = sphi %s784_s10, %s973_s10   ;;  %s744_s9 = sphi %s782_s9, %s972_s9  }
   0x9   : > { %s33_s17 = sadd.s32 1, %s760_s13  ;;  %s42_s18 = sadd.s32 1, %s752_s11 }
   0xa   : > { %p35_p0 = scmp.ge.s32.totalorder %s33_s17, 2  ;;  %p49_p1 = scmp.ne.s32.totalorder %s752_s11, %s748_s10 }
   0xb   : > { %p50_p2 = scmp.eq.s32.totalorder %s764_s14, 0  ;;  %p55_p3 = scmp.ne.s32.totalorder %s748_s10, %s744_s9 }
   0xc   : > { %s978_s17 = smov (%p35_p0, %s33_s17), 0  ;;  %p56_p5 = scmp.eq.s32.totalorder %s523_s15, 0 }
   0xd   : > { %p823_p4 = por %p50_p2, %p49_p1  ;;  %s37_s20 = ssub.s32 %s760_s13, %s978_s17 }
   0xe   : > { %p107_p6 = scmp.eq.s32.totalorder %s523_s15, 1  ;;  %p40_p7 = scmp.eq.s32.totalorder %s37_s20, 0 }
   0xf   : > { %p829_p8 = por %p56_p5, %p55_p3  ;;  %p113_p10 = scmp.eq.s32.totalorder %s524_s16, 1 }
  0x10   : > { %p833_p9 = por %p107_p6, %p49_p1  ;;  %p526_p12 = scmp.ge.s32.totalorder %s764_s14, 2 }
  0x11   : > { %s838_s23 = scalar_select %p40_p7, %s752_s11, %s42_s18  }
  0x12   : > { %p840_p11 = por %p113_p10, %p55_p3  ;;  %p559_p13 = scmp.lt.s32.totalorder %s764_s14, 2 }
  0x13   : > { %s133_s25 = sand.u32 1, %s752_s11   ;;  %s539_s27 = sshll.u32 %s760_s13, 3 }
  0x14   : > { %s527_s26 = sshll.u32 %s133_s25, 3  ;;  %s144_s30 = scalar_lea.hbm %s960_s0, %s539_s27 }
  0x15   : > { %s137_s3 = scalar_lea.vmem [#allocation5], %s527_s26  ;;  %s146_s5 = sshll.u32 %s144_s30, 4  ;;  %s147_s5 = int_to_ptr.hbm [resolvable:$true] %s146_s5 }
  0x16   : > { %s148_s4 = sshll.u32 %s137_s3, 4  ;;  %p853_p0 = pnand %p559_p13, %p823_p4  ;;  %s149_s4 = int_to_ptr.vmem [resolvable:$true] %s148_s4 }
  0x17   : > { %p532_p1 = scmp.ge.s32.totalorder %s764_s14, 1  ;;  %p174_p2 = scmp.lt.s32.totalorder %s764_s14, 3 }
  0x18   : > { %s134_s7 = scalar_lea.sflag [#allocation6], %s133_s25  ;;  %s530_s8 = sshll.u32 %s133_s25, 1 }
  0x19   : > { %551 = dma.hbm_to_vmem [thread:$0]  (!%p853_p0), %s147_s5, 128, %s149_s4, %s134_s7  }
  0x1a   : > { %p175_p3 = pnand %p532_p1, %p174_p2  ;;  %s531_s15 = sshll.u32 %s760_s13, 1 }
  0x1b   : > { %s165_s20 = scalar_lea.hbm %s961_s1, %s531_s15  ;;  %s159_s26 = scalar_lea.vmem [#allocation8], %s530_s8 }
  0x1c   : > { %s169_s19 = sshll.u32 %s159_s26, 4  ;;  %s167_s27 = sshll.u32 %s165_s20, 4  ;;  %s170_s19 = int_to_ptr.vmem [resolvable:$true] %s169_s19  ;;  %s168_s27 = int_to_ptr.hbm [resolvable:$true] %s167_s27 }
  0x1d   : > { %s156_s28 = scalar_lea.sflag [#allocation9], %s133_s25  ;;  %178 = sbr.rel (%p175_p3) target bundleno = 483 (0x1e3), region = 28 }
  0x1e   : > { %554 = dma.hbm_to_vmem [thread:$0]  (!%p853_p0), %s168_s27, 32, %s170_s19, %s156_s28  }
  0x1f   : > { %s868_s29 = sand.u32 (!%p175_p3), 1, %s748_s10  }
  0x20   : > { %s533_s30 = sshll.u32 (!%p175_p3), %s868_s29, 3  ;;  %s181_s3 = scalar_lea.sflag (!%p175_p3), [#allocation6], %s868_s29 }
  0x21   : > { %s184_s4 = scalar_lea.vmem (!%p175_p3), [#allocation5], %s533_s30 }
  0x22   : > { %731 = dma.done.wait (%p829_p8), %s181_s3, 128  }
  0x23   : > { %733 = vsyncadd (%p829_p8), %s181_s3, 4294967168  ;;  %s534_s25 = sshll.u32 %s868_s29, 1  ;;  %s191_s5 = scalar_lea.sflag [#allocation9], %s868_s29 }
  0x24   : > { %s878_s6 = scalar_lea.vmem [#allocation8], %s534_s25 }
  0x25   : > { %735 = dma.done.wait (%p829_p8), %s191_s5, 32  }
  0x26   : > { %737 = vsyncadd (%p829_p8), %s191_s5, 4294967264  ;;  %v230_v0 = vld [vmem:[%s184_s4] sm:$0xff]  ;;  %vm238_vm0 = vcmask 1043456   ;;  %v315_v38 = vlaneseq  ;;  %v231_v39 = vld [vmem:[%s878_s6] sm:$0x3]  ;;  %v766_v60 = vmov 0.0   ;;  %s417_s8 = scalar_lea.hbm %s962_s2, %s756_s12 }
  0x27   : > { %233 = vst [vmem:[#allocation1] ss:$2 sm:$0xff] %v230_v0  ;;  %v318_v41 = vperm.slane %v231_v39, 1  ;;  %v317_v48 = vperm.slane %v231_v39, 0  ;;  %vm226_vm11 = vcmask 3072   ;;  %s219_s15 = scalar_lea.vmem [#allocation10], %s868_s29 }
  0x28   : > { %v316_v40 = vshrl.u32 %v315_v38, 7  ;;  %228 = vst.msk [vmem:[#allocation3] sm:$0xf] %vm226_vm11, %v766_v60  ;;  %s419_s16 = sshll.u32 %s219_s15, 4  ;;  %s421_s18 = sshll.u32 %s417_s8, 4  ;;  %s420_s16 = int_to_ptr.vmem [resolvable:$true] %s419_s16  ;;  %s422_s18 = int_to_ptr.hbm [resolvable:$true] %s421_s18 }
  0x29   : > { %227 = vst.msk [vmem:[#allocation2] sm:$0xf] %vm226_vm11, %v766_v60  ;;  %s409_s19 = scalar_lea.sflag [#allocation7], %s868_s29  ;;  %s692_s27 = sshra.s32 %s422_s18, 4  ;;  %s693_s27 = int_to_ptr.hbm [resolvable:$true] %s692_s27 }
  0x2a   : > { %vm893_vm1 = vcmp.eq.s32.totalorder %v318_v41, %v316_v40  ;;  %vm319_vm10 = vcmp.eq.s32.totalorder %v317_v48, %v316_v40  ;;  %229 = vst.msk [vmem:[#allocation4] sm:$0xf] %vm226_vm11, %v766_v60  ;;  %s694_s28 = scalar_lea.hbm %s693_s27, 1  ;;  %s698_s12 = scalar_lea.hbm %s962_s2, 2 }
  0x2b   : > { %v536_v61 = vsel %vm893_vm1, 1.0, %v766_v60  ;;  %p695_p4 = scmp.ne.s32.totalorder %s693_s27, %s694_s28  ;;  %p699_p7 = scmp.lt.s32.totalorder %s693_s27, %s962_s2 }
  0x2c   : > { %p700_p8 = scmp.lt.s32.totalorder %s698_s12, %s694_s28 }
  0x2d   : > { %p696_p5 = pnand %p695_p4, %p833_p9 }
  0x2e   : > { %v234_v1 = vld.sshfl [vmem:[#allocation1] sm:$0xff pattern:$0x75316420]  ;;  %v235_v2 = vld.sshfl [vmem:[#allocation1 + $0x8] sm:$0xff pattern:$0x75316420]  ;;  %p701_p10 = por %p700_p8, %p699_p7 }
  0x2f   : > { %v239_v3 = vsel %vm238_vm0, %v234_v1, -inf  ;;  %v246_v4 = vsel %vm238_vm0, %v235_v2, -inf  ;;  %v328_v1 = vrot.slane %v536_v61, 4  ;;  %p697_p6 = pneg %p696_p5 }
  0x30   : > { %v240_v5 = vrot.slane %v239_v3, 4  ;;  %v247_v6 = vrot.slane %v246_v4, 4 }
  0x31   : > { %p702_p13 = pnand %p701_p10, %p697_p6 }
  0x32   : > { %v241_v7 = vmax.f32 %v239_v3, %v240_v5  ;;  %v248_v8 = vmax.f32 %v246_v4, %v247_v6  ;;  %v535_v4 = vsel %vm319_vm10, 1.0, %v766_v60 }
  0x34   : > { %v242_v9 = vrot.slane %v241_v7, 2  ;;  %v249_v10 = vrot.slane %v248_v8, 2 }
  0x36   : > { %v243_v11 = vmax.f32 %v241_v7, %v242_v9  ;;  %v250_v12 = vmax.f32 %v248_v8, %v249_v10  ;;  %v329_v7 = vsel %vm238_vm0, %v535_v4, %v328_v1 }
  0x38   : > { %v244_v13 = vrot.slane %v243_v11, 1  ;;  %v251_v14 = vrot.slane %v250_v12, 1 }
  0x3a   : > { %v245_v15 = vmax.f32 %v243_v11, %v244_v13  ;;  %v252_v16 = vmax.f32 %v250_v12, %v251_v14 }
  0x3c   : > { %v255_v17 = vrot.slane %v252_v16, 4 }
  0x3e   : > { %v256_v18 = vsel %vm238_vm0, %v245_v15, %v255_v17 }
  0x3f   : > { %v258_v19 = vsub.f32 %v230_v0, %v256_v18 }
  0x41   : > { %v259_v20 = vmul.f32 1.442695, %v258_v19 }
  0x43   : > { %610 = vpow2.f32 %v259_v20 }
  0x49   : > { %v887_v21 = vpop.eup %610 }
  0x4a   : > { %262 = vst [vmem:[#allocation1] ss:$2 sm:$0xff] %v887_v21 }
  0x51   : > { %v263_v22 = vld.sshfl [vmem:[#allocation1] sm:$0xff pattern:$0x75316420]  ;;  %v264_v23 = vld.sshfl [vmem:[#allocation1 + $0x8] sm:$0xff pattern:$0x75316420] }
  0x52   : > { %v267_v24 = vsel %vm238_vm0, %v263_v22, 0.0  ;;  %v274_v25 = vsel %vm238_vm0, %v264_v23, 0.0  ;;  %v363_v22 = vsel %vm238_vm0, %v536_v61, 0.0 }
  0x53   : > { %v268_v26 = vrot.slane %v267_v24, 4  ;;  %v275_v27 = vrot.slane %v274_v25, 4 }
  0x55   : > { %v269_v28 = vadd.f32 %v268_v26, %v267_v24  ;;  %v276_v29 = vadd.f32 %v275_v27, %v274_v25  ;;  %v325_v24 = vld [vmem:[#allocation2] sm:$0xf]  ;;  %v346_v27 = vld [vmem:[#allocation3] sm:$0xf] }
  0x57   : > { %v270_v30 = vrot.slane %v269_v28, 2  ;;  %v277_v31 = vrot.slane %v276_v29, 2 }
  0x59   : > { %v271_v32 = vadd.f32 %v270_v30, %v269_v28  ;;  %v278_v33 = vadd.f32 %v277_v31, %v276_v29  ;;  %v361_v30 = vld [vmem:[#allocation4] sm:$0xf] }
  0x5b   : > { %v272_v34 = vrot.slane %v271_v32, 1  ;;  %v279_v35 = vrot.slane %v278_v33, 1 }
  0x5d   : > { %v273_v36 = vadd.f32 %v272_v34, %v271_v32  ;;  %v280_v37 = vadd.f32 %v279_v35, %v278_v33 }
  0x5f   : > { %612 = vrcp.f32 %v273_v36  ;;  %vm286_vm2 = vweird.f32 %v273_v36  ;;  %v290_v46 = vand.u32 2147483647, %v273_v36  ;;  %v292_v50 = vand.u32 2147483648, %v273_v36 }
  0x60   : > { %614 = vrcp.f32 %v280_v37  ;;  %v306_v51 = vand.u32 2147483648, %v280_v37  ;;  %vm300_vm4 = vweird.f32 %v280_v37  ;;  %v304_v53 = vand.u32 2147483647, %v280_v37 }
  0x61   : > { %v293_v58 = vor.u32 1.1754944e-38, %v292_v50  ;;  %vm291_vm8 = vcmp.eq.f32.partialorder %v290_v46, 8.507059e+37 }
  0x62   : > { %v307_v59 = vor.u32 1.1754944e-38, %v306_v51  ;;  %vm305_vm9 = vcmp.eq.f32.partialorder %v304_v53, 8.507059e+37 }
  0x65   : > { %v613_v42 = vpop.eup %612 }
  0x66   : > { %v615_v43 = vpop.eup %614  ;;  %v282_v44 = vmul.f32 %v613_v42, %v273_v36  ;;  %vm287_vm3 = vweird.f32 %v613_v42 }
  0x67   : > { %v296_v47 = vmul.f32 %v615_v43, %v280_v37  ;;  %vm301_vm5 = vweird.f32 %v615_v43  ;;  %vm897_vm6 = vmor %vm286_vm2, %vm287_vm3 }
  0x68   : > { %v283_v49 = vsub.f32 1.0, %v282_v44  ;;  %vm302_vm7 = vmor %vm300_vm4, %vm301_vm5 }
  0x69   : > { %v297_v52 = vsub.f32 1.0, %v296_v47 }
  0x6a   : > { %v284_v54 = vmul.f32 %v613_v42, %v283_v49 }
  0x6b   : > { %v298_v56 = vmul.f32 %v615_v43, %v297_v52 }
  0x6c   : > { %v285_v57 = vadd.f32 %v613_v42, %v284_v54 }
  0x6d   : > { %v299_v62 = vadd.f32 %v615_v43, %v298_v56 }
  0x6e   : > { %v289_v63 = vsel %vm897_vm6, %v613_v42, %v285_v57 }
  0x6f   : > { %v303_v0 = vsel %vm302_vm7, %v615_v43, %v299_v62  ;;  %v294_v2 = vsel %vm291_vm8, %v293_v58, %v289_v63 }
  0x70   : > { %v308_v3 = vsel %vm305_vm9, %v307_v59, %v303_v0 }
  0x71   : > { %v311_v5 = vrot.slane %v308_v3, 4 }
  0x73   : > { %v312_v6 = vsel %vm238_vm0, %v294_v2, %v311_v5 }
  0x74   : > { %v314_v8 = vmul.f32 %v887_v21, %v312_v6  ;;  %v362_v21 = vsel %vm238_vm0, %v535_v4, 0.0 }
  0x75   : > { %v364_v23 = vadd.f32 %v363_v22, %v362_v21 }
  0x76   : > { %v331_v9 = vmul.f32 %v329_v7, %v314_v8  ;;  %v347_v10 = vmul.f32 %v314_v8, %v314_v8 }
  0x78   : > { %333 = vst [vmem:[#allocation1] ss:$2 sm:$0xff] %v331_v9 }
  0x7f   : > { %v334_v11 = vld.sshfl [vmem:[#allocation1] sm:$0xff pattern:$0x75316420]  ;;  %v335_v12 = vld.sshfl [vmem:[#allocation1 + $0x8] sm:$0xff pattern:$0x75316420] }
  0x80   : > { %349 = vst [vmem:[#allocation1] ss:$2 sm:$0xff] %v347_v10  ;;  %v338_v13 = vsel %vm238_vm0, %v334_v11, 0.0  ;;  %v339_v14 = vsel %vm238_vm0, %v335_v12, 0.0 }
  0x81   : > { %v340_v15 = vadd.f32 %v339_v14, %v338_v13 }
  0x83   : > { %341 = vadd.xlane.f32.xlu1 %v340_v15 }
  0x87   : > { %v350_v16 = vld.sshfl [vmem:[#allocation1] sm:$0xff pattern:$0x75316420]  ;;  %v351_v17 = vld.sshfl [vmem:[#allocation1 + $0x8] sm:$0xff pattern:$0x75316420] }
  0x88   : > { %v354_v18 = vsel %vm238_vm0, %v350_v16, 0.0  ;;  %v355_v19 = vsel %vm238_vm0, %v351_v17, 0.0 }
  0x89   : > { %v356_v20 = vadd.f32 %v355_v19, %v354_v18 }
  0x8b   : > { %357 = vadd.xlane.f32.xlu0 %v356_v20 }
  0x93   : > { %365 = vadd.xlane.f32.xlu0 %v364_v23 }
  0xf6   : > { %v342_v25 = vpop.xlane.xlu1 %341 }
  0xf7   : > { %v343_v26 = vadd.f32 %v342_v25, %v325_v24 }
  0xf9   : > { %345 = vst.msk [vmem:[#allocation2] sm:$0xf] %vm226_vm11, %v343_v26 }
  0xfe   : > { %v358_v28 = vpop.xlane.xlu0 %357 }
  0xff   : > { %v359_v29 = vadd.f32 %v358_v28, %v346_v27 }
 0x100   : > { %v372_v38 = vld [vmem:[#allocation2] sm:$0xf] }
 0x101   : > { %360 = vst.msk [vmem:[#allocation3] sm:$0xf] %vm226_vm11, %v359_v29  ;;  %v373_v40 = vmul.f32 2.0, %v372_v38 }
 0x103   : > { %v374_v45 = vadd.f32 1e-05, %v373_v40 }
 0x106   : > { %v366_v31 = vpop.xlane.xlu0 %365 }
 0x107   : > { %v367_v32 = vadd.f32 %v366_v31, %v361_v30 }
 0x108   : > { %v375_v33 = vld [vmem:[#allocation3] sm:$0xf] }
 0x109   : > { %368 = vst.msk [vmem:[#allocation4] sm:$0xf] %vm226_vm11, %v367_v32 }
 0x110   : > { %v376_v34 = vld [vmem:[#allocation4] sm:$0xf] }
 0x111   : > { %v377_v35 = vadd.f32 %v376_v34, %v375_v33 }
 0x113   : > { %v378_v36 = vadd.f32 1e-05, %v377_v35 }
 0x115   : > { %616 = vrcp.f32 %v378_v36  ;;  %v390_v42 = vand.u32 2147483648, %v378_v36  ;;  %v388_v44 = vand.u32 2147483647, %v378_v36  ;;  %vm384_vm13 = vweird.f32 %v378_v36 }
 0x117   : > { %v391_v47 = vor.u32 1.1754944e-38, %v390_v42  ;;  %vm389_vm15 = vcmp.eq.f32.partialorder %v388_v44, 8.507059e+37 }
 0x11b   : > { %v617_v37 = vpop.eup %616 }
 0x11c   : > { %v380_v39 = vmul.f32 %v617_v37, %v378_v36  ;;  %vm385_vm12 = vweird.f32 %v617_v37 }
 0x11d   : > { %vm386_vm14 = vmor %vm384_vm13, %vm385_vm12 }
 0x11e   : > { %v381_v41 = vsub.f32 1.0, %v380_v39 }
 0x120   : > { %v382_v43 = vmul.f32 %v617_v37, %v381_v41 }
 0x122   : > { %v383_v46 = vadd.f32 %v617_v37, %v382_v43 }
 0x124   : > { %v387_v48 = vsel %vm386_vm14, %v617_v37, %v383_v46 }
 0x125   : > { %v392_v49 = vsel %vm389_vm15, %v391_v47, %v387_v48 }
 0x126   : > { %v393_v50 = vmul.f32 %v392_v49, %v374_v45 }
 0x128   : > { %v394_v51 = vsub.f32 1.0, %v393_v50 }
 0x12a   : > { %v395_v52 = vsel %vm226_vm11, %v394_v51, 0.0 }
 0x12b   : > { %396 = vadd.xlane.f32.xlu1 %v395_v52 }
 0x19e   : > { %v397_v53 = vpop.xlane.xlu1 %396 }
 0x19f   : > { %v398_v54 = vrot.slane %v397_v53, 4 }
 0x1a1   : > { %v399_v55 = vadd.f32 %v398_v54, %v397_v53 }
 0x1a3   : > { %v400_v56 = vrot.slane %v399_v55, 2 }
 0x1a5   : > { %v401_v57 = vadd.f32 %v400_v56, %v399_v55 }
 0x1a7   : > { %v402_v58 = vrot.slane %v401_v57, 1 }
 0x1a9   : > { %v403_v59 = vadd.f32 %v402_v58, %v401_v57 }
 0x1ab   : > { %540 = vpush %v403_v59 }
 0x1dc   : > { %s541_s20 = spop %540 }
 0x1dd   : > { %s405_s26 = smul.f32 0.25, %s541_s20 }
 0x1df   : > { %v406_v60 = vstv %s405_s26 }
 0x1e0   : > { %407 = vst [vmem:[%s219_s15] sm:$0x1] %v406_v60 }
 0x1e1   : > { %705 = shalt.err (!%p702_p13)
}
 0x1e2   : > { %546 = dma.vmem_to_hbm [thread:$0]  (%p833_p9), %s420_s16, 16, %s422_s18, %s409_s19  }
 0x1e3 PF: > { %s433_s29 = sand.u32 1, %s744_s9   ;;  %p556_p0 = pnand %p526_p12, %p840_p11 }
 0x1e4   : > { %s434_s5 = scalar_lea.sflag [#allocation7], %s433_s29 }
 0x1e5   : > { %p557_p1 = pneg %p556_p0 }
 0x1e7   : > { %739 = dma.done.wait (%p557_p1), %s434_s5, 16  }
 0x1e8   : > { %741 = vsyncadd (%p557_p1), %s434_s5, 4294967280  ;;  %s21_s14 = sadd.s32 1, %s764_s14   ;;  %s972_s9 = smov %s748_s10 }
 0x1e9   : > { %p18_p2 = scmp.ge.s32.totalorder %s21_s14, 4   ;;  %s973_s10 = smov %s752_s11 }
 0x1ea   : > { %s974_s11 = smov %s838_s23  ;;  %s975_s12 = smov %s760_s13 }
 0x1eb   : > { %s976_s13 = smov %s978_s17  ;;  %20 = sbr.rel (!%p18_p2) target bundleno = 8 (0x8), region = 94 }
 0x1f0   :  { %439 = vsyncpa [#allocation6], 1 }
 0x1f1   :  { %441 = vsyncpa [#allocation6 + $0x1], 1 }
 0x1f2   :  { %442 = vsyncpa [#allocation9], 1 }
 0x1f3   :  { %444 = vsyncpa [#allocation9 + $0x1], 1 }
 0x1f4   :  { %445 = vsyncpa [#allocation7], 1 }
 0x1f5   :  { %447 = vsyncpa [#allocation7 + $0x1], 1 }

</bundles_post_ra>
